<compile_context>
chip_gen: v7x
topology: tpu7x:2x2x1
jax: 0.10.0
libtpu: 0.0.40
codegen_flags: <defaults>
</compile_context>

<pallas_src>
import functools

import jax
import jax.numpy as jnp
from jax.experimental import pallas as pl
from jax.experimental.pallas import tpu as pltpu


def _round_up(x, m):
    return ((x + m - 1) // m) * m


def _cdiv(a, b):
    return (a + b - 1) // b


def _layernorm_kernel(x_ref, a_ref, b_ref, o_ref, *, eps, d_hid):
    # x_ref: (TR, d_hid) row tile; a_ref / b_ref: (1, d_hid) resident scale/shift.
    x = x_ref[...].astype(jnp.float32)
    a = a_ref[...].astype(jnp.float32)
    b = b_ref[...].astype(jnp.float32)

    n = jnp.float32(d_hid)
    # Two-pass mean/variance: the tile is already resident in VMEM so the second
    # sweep is free for this memory-bound kernel, and it avoids the catastrophic
    # cancellation of the one-pass E[x^2] - mu^2 formulation.
    mu = jnp.sum(x, axis=-1, keepdims=True) * (1.0 / n)
    diff = x - mu
    # torch.std uses the UNBIASED estimator (ddof=1): divide by (d_hid - 1).
    var = jnp.sum(diff * diff, axis=-1, keepdims=True) * jnp.float32(1.0 / (d_hid - 1))
    sigma = jnp.sqrt(var)

    # eps is added to sigma (std), not variance, exactly as in the module.
    # approx=True reciprocal (~2^-12 rel err) misses the 1e-5 tolerance; use exact.
    inv = pl.reciprocal(sigma + jnp.float32(eps), approx=False)
    o_ref[...] = (diff * inv * a + b).astype(o_ref.dtype)


def layer_normalization(z, a_2, b_2, eps=0.001):
    """Pallas implementation of LayerNormalization.forward.

    z    : (..., d_hid) array
    a_2  : (d_hid,) scale (init ones)
    b_2  : (d_hid,) shift (init zeros)
    """
    # PyTorch: if z.size(1) == 1: return z  (static shape check -> Python)
    if z.ndim >= 2 and z.shape[1] == 1:
        return z

    d_hid = z.shape[-1]
    # TODO(synk): d_hid == 1 makes the unbiased-std divisor zero (inf/nan),
    # same behaviour as the PyTorch module; not special-cased here.
    orig_shape = z.shape
    rows = 1
    for s in orig_shape[:-1]:
        rows *= s
    x2d = z.reshape(rows, d_hid)
    a2d = a_2.reshape(1, d_hid)
    b2d = b_2.reshape(1, d_hid)

    itemsize = jnp.dtype(z.dtype).itemsize

    # Row tile: multiple of 8, capped so the 4 double-buffered in/out tiles stay
    # under ~24 MiB (safe for v7x's 64 MiB physical VMEM), absolute cap 2048 to
    # amortize the ~0.35 us per-grid-step overhead. Also cap at cdiv(rows, 2) so
    # the "parallel" row grid has >= 2 steps (both v7x TensorCores get work).
    vmem_tile_budget = 24 * 1024 * 1024
    tr_cap = max(8, min(2048, (vmem_tile_budget // (4 * d_hid * itemsize)) // 8 * 8))
    TR = max(8, min(tr_cap, _round_up(_cdiv(rows, 2), 8)))
    if rows < TR:
        TR = rows  # block == full array dim, no padding needed
    grid = _cdiv(rows, TR)

    kernel = functools.partial(_layernorm_kernel, eps=eps, d_hid=d_hid)

    # Tight VMEM limit: double-buffered in + out tiles, resident params, slack.
    tile_bytes = TR * d_hid * itemsize
    param_bytes = 2 * 2 * d_hid * jnp.dtype(a_2.dtype).itemsize
    vmem_limit = int(min(max(4 * tile_bytes + param_bytes + (4 << 20), 8 << 20), 32 << 20))

    out = pl.pallas_call(
        kernel,
        out_shape=jax.ShapeDtypeStruct((rows, d_hid), z.dtype),
        grid=(grid,),
        in_specs=[
            pl.BlockSpec((TR, d_hid), lambda i: (i, 0)),
            pl.BlockSpec((1, d_hid), lambda i: (0, 0)),   # a_2 resident across grid
            pl.BlockSpec((1, d_hid), lambda i: (0, 0)),   # b_2 resident across grid
        ],
        out_specs=pl.BlockSpec((TR, d_hid), lambda i: (i, 0)),
        compiler_params=pltpu.CompilerParams(
            dimension_semantics=("parallel",),
            vmem_limit_bytes=vmem_limit,
        ),
    )(x2d, a2d, b2d)

    return out.reshape(orig_shape)


def _reference(z, a_2, b_2, eps=0.001):
    if z.ndim >= 2 and z.shape[1] == 1:
        return z
    mu = jnp.mean(z, axis=-1, keepdims=True)
    sigma = jnp.std(z, axis=-1, keepdims=True, ddof=1)  # unbiased, like torch.std
    out = (z - mu) / (sigma + eps)
    return out * a_2 + b_2


if __name__ == "__main__":
    key = jax.random.PRNGKey(0)
    # Shapes consistent with the module: d_model = 300, small batch / seq.
    batch, seq, d_hid = 2, 8, 300

    x = jax.random.normal(key, (batch, seq, d_hid), dtype=jnp.float32)

    # Deterministic parameter init matching nn.Parameter(torch.ones/zeros(d_hid))
    a_2 = jnp.ones((d_hid,), dtype=jnp.float32)
    b_2 = jnp.zeros((d_hid,), dtype=jnp.float32)

    out = layer_normalization(x, a_2, b_2, eps=0.001)
    out = jax.block_until_ready(out)

    ref = _reference(x, a_2, b_2, eps=0.001)
    assert out.shape == x.shape
    assert jnp.allclose(out, ref, atol=1e-5, rtol=1e-5), "mismatch vs reference"

    # Ragged-last-block case (rows not a multiple of the row tile).
    x2 = jax.random.normal(jax.random.PRNGKey(1), (3, 5, d_hid), dtype=jnp.float32)
    out2 = jax.block_until_ready(layer_normalization(x2, a_2, b_2, eps=0.001))
    ref2 = _reference(x2, a_2, b_2, eps=0.001)
    assert out2.shape == x2.shape
    assert jnp.allclose(out2, ref2, atol=1e-5, rtol=1e-5), "ragged-block mismatch"

    print("KERNEL_OK")
</pallas_src>

<mosaic_0001>
module attributes {stable_mosaic.version = 11 : i64} {
  func.func @_layernorm_kernel(%arg0: i32, %arg1: memref<8x300xf32, #tpu.memory_space<vmem>>, %arg2: memref<1x300xf32, #tpu.memory_space<vmem>>, %arg3: memref<1x300xf32, #tpu.memory_space<vmem>>, %arg4: memref<8x300xf32, #tpu.memory_space<vmem>>) attributes {dimension_semantics = [#tpu.dimension_semantics<parallel>], iteration_bounds = array<i64: 2>, scalar_prefetch = 0 : i64, scratch_operands = 0 : i64, tpu.core_type = #tpu.core_type<tc>, window_params = [{transform_indices = @transform_0, window_bounds = array<i64: 8, 300>}, {pipeline_mode = #tpu.pipeline_mode<synchronous>, transform_indices = @transform_1, window_bounds = array<i64: 1, 300>}, {pipeline_mode = #tpu.pipeline_mode<synchronous>, transform_indices = @transform_2, window_bounds = array<i64: 1, 300>}, {transform_indices = @transform_3, window_bounds = array<i64: 8, 300>}]} {
    %c0 = arith.constant 0 : index
    %c0_0 = arith.constant 0 : index
    %0 = vector.load %arg1[%c0, %c0_0] : memref<8x300xf32, #tpu.memory_space<vmem>>, vector<8x300xf32>
    %c0_1 = arith.constant 0 : index
    %c0_2 = arith.constant 0 : index
    %1 = vector.load %arg2[%c0_1, %c0_2] : memref<1x300xf32, #tpu.memory_space<vmem>>, vector<1x300xf32>
    %c0_3 = arith.constant 0 : index
    %c0_4 = arith.constant 0 : index
    %2 = vector.load %arg3[%c0_3, %c0_4] : memref<1x300xf32, #tpu.memory_space<vmem>>, vector<1x300xf32>
    %cst = arith.constant dense<0.000000e+00> : vector<8xf32>
    %3 = vector.multi_reduction <add>, %0, %cst [1] : vector<8x300xf32> to vector<8xf32>
    %4 = vector.shape_cast %3 : vector<8xf32> to vector<8x1xf32>
    %cst_5 = arith.constant 1.000000e+00 : f32
    %cst_6 = arith.constant 3.000000e+02 : f32
    %5 = arith.divf %cst_5, %cst_6 : f32
    %6 = vector.broadcast %5 : f32 to vector<8x1xf32>
    %7 = arith.mulf %4, %6 : vector<8x1xf32>
    %8 = vector.broadcast %7 : vector<8x1xf32> to vector<8x300xf32>
    %9 = arith.subf %0, %8 : vector<8x300xf32>
    %10 = arith.mulf %9, %9 : vector<8x300xf32>
    %cst_7 = arith.constant dense<0.000000e+00> : vector<8xf32>
    %11 = vector.multi_reduction <add>, %10, %cst_7 [1] : vector<8x300xf32> to vector<8xf32>
    %12 = vector.shape_cast %11 : vector<8xf32> to vector<8x1xf32>
    %cst_8 = arith.constant 0.00334448158 : f32
    %13 = vector.broadcast %cst_8 : f32 to vector<8x1xf32>
    %14 = arith.mulf %12, %13 : vector<8x1xf32>
    %15 = math.sqrt %14 : vector<8x1xf32>
    %cst_9 = arith.constant 1.000000e-03 : f32
    %16 = vector.broadcast %cst_9 : f32 to vector<8x1xf32>
    %17 = arith.addf %15, %16 : vector<8x1xf32>
    %18 = tpu.reciprocal %17 : vector<8x1xf32> -> vector<8x1xf32>
    %19 = vector.broadcast %18 : vector<8x1xf32> to vector<8x300xf32>
    %20 = arith.mulf %9, %19 : vector<8x300xf32>
    %21 = vector.broadcast %1 : vector<1x300xf32> to vector<8x300xf32>
    %22 = arith.mulf %20, %21 : vector<8x300xf32>
    %23 = vector.broadcast %2 : vector<1x300xf32> to vector<8x300xf32>
    %24 = arith.addf %22, %23 : vector<8x300xf32>
    %c0_10 = arith.constant 0 : index
    %c0_11 = arith.constant 0 : index
    %25 = vector.load %arg4[%c0_10, %c0_11] : memref<8x300xf32, #tpu.memory_space<vmem>>, vector<8x300xf32>
    tpu.vector_store %arg4[%c0_10, %c0_11], %24 {strides = array<i32>} : memref<8x300xf32, #tpu.memory_space<vmem>>, vector<8x300xf32>,
    return
  }
  func.func @transform_0(%arg0: i32) -> (i32, i32) {
    %c0_i32 = arith.constant 0 : i32
    %c0_i32_0 = arith.constant 0 : i32
    return %arg0, %c0_i32 : i32, i32
  }
  func.func @transform_1(%arg0: i32) -> (i32, i32) {
    %c0_i32 = arith.constant 0 : i32
    %c0_i32_0 = arith.constant 0 : i32
    %c0_i32_1 = arith.constant 0 : i32
    return %c0_i32, %c0_i32_0 : i32, i32
  }
  func.func @transform_2(%arg0: i32) -> (i32, i32) {
    %c0_i32 = arith.constant 0 : i32
    %c0_i32_0 = arith.constant 0 : i32
    %c0_i32_1 = arith.constant 0 : i32
    return %c0_i32, %c0_i32_0 : i32, i32
  }
  func.func @transform_3(%arg0: i32) -> (i32, i32) {
    %c0_i32 = arith.constant 0 : i32
    %c0_i32_0 = arith.constant 0 : i32
    return %arg0, %c0_i32 : i32, i32
  }
}

</mosaic_0001>

<bundles_post_ra>
// kernel: tpu_custom_call.1
= control target key start
LH: loop header
LB: loop body
LE: loop exit
PB: predicated region body
PF: predicated region fallthrough
CT: control target
= control target key end

     0   :  { %8 = vsyncpa [#allocation3], 0  ;;  %s699_s0 = inlined_call_operand.hbm [shape: f32[16,300], index: 0, kind: input, shape index: {}]   ;;  %s700_s1 = inlined_call_operand.vmem [shape: f32[1,300], index: 1, kind: input, shape index: {}]   ;;  %s701_s2 = inlined_call_operand.vmem [shape: f32[1,300], index: 2, kind: input, shape index: {}]   ;;  %s702_s3 = inlined_call_operand.hbm [shape: f32[16,300], index: 3, kind: output, shape index: {}]  }
   0x1   :  { %10 = vsyncpa [#allocation3 + $0x1], 0 }
   0x2   :  { %11 = vsyncpa [#allocation4], 0 }
   0x3   :  { %13 = vsyncpa [#allocation4 + $0x1], 0  ;;  %s531_s12 = smov 0   ;;  %s533_s13 = smov 0  }
   0x4   :  { %s535_s14 = smov 0   ;;  %s537_s15 = smov 0  }
   0x5 LB: > { %s552_s16 = sadd.s32 4294967295, %s507_s15   ;;  %s349_s17 = sadd.s32 4294967294, %s507_s15   ;;  %s507_s15 = sphi %s537_s15, %s716_s15   ;;  %s503_s14 = sphi %s535_s14, %s715_s14   ;;  %s499_s13 = sphi %s533_s13, %s714_s13   ;;  %s495_s12 = sphi %s531_s12, %s713_s12  }
   0x6   : > { %s556_s18 = sadd.s32 1, %s507_s15   ;;  %s26_s19 = sadd.s32 1, %s503_s14 }
   0x7   : > { %s23_s20 = ssub.s32 %s507_s15, %s556_s18  ;;  %p33_p0 = scmp.ne.s32.totalorder %s503_s14, %s499_s13 }
   0x8   : > { %p24_p1 = scmp.eq.s32.totalorder %s23_s20, 0  ;;  %p34_p2 = scmp.eq.s32.totalorder %s507_s15, 0 }
   0x9   : > { %p39_p3 = scmp.ne.s32.totalorder %s499_s13, %s495_s12  ;;  %p40_p4 = scmp.eq.s32.totalorder %s552_s16, 0 }
   0xa   : > { %s568_s21 = scalar_select %p24_p1, %s503_s14, %s26_s19  }
   0xb   : > { %p35_p5 = por %p34_p2, %p33_p0  ;;  %p570_p6 = por %p40_p4, %p39_p3 }
   0xc   : > { %p105_p7 = scmp.eq.s32.totalorder %s552_s16, 1  ;;  %p111_p8 = scmp.eq.s32.totalorder %s349_s17, 1 }
   0xd   : > { %p373_p10 = scmp.lt.s32.totalorder %s507_s15, 2  ;;  %s137_s25 = sand.u32 1, %s503_s14  }
   0xe   : > { %p577_p11 = por %p105_p7, %p33_p0  ;;  %p581_p12 = por %p111_p8, %p39_p3 }
   0xf   : > { %s358_s26 = smul.u32 384, %s507_s15  ;;  %p592_p13 = pnand %p373_p10, %p35_p5 }
  0x10   : > { %s705_s23 = scalar_select %p577_p11, 1, 0 }
  0x11   : > { %s706_s24 = scalar_select %p581_p12, 1, 0 }
  0x12   : > { %s357_s27 = smul.u32 24, %s137_s25  ;;  %s590_s30 = scalar_lea.hbm %s699_s0, %s358_s26 }
  0x13   : > { %s138_s7 = scalar_lea.sflag [#allocation3], %s137_s25  ;;  %s411_s8 = scalar_lea.hbm %s590_s30, 384 }
  0x14   : > { %s141_s5 = scalar_lea.vmem [#allocation2], %s357_s27  ;;  %p412_p2 = scmp.ne.s32.totalorder %s590_s30, %s411_s8 }
  0x15   : > { %s149_s6 = sshll.u32 %s141_s5, 4  ;;  %p413_p3 = pneg %p592_p13  ;;  %s597_s6 = int_to_ptr.vmem [resolvable:$true] %s149_s6 }
  0x16   : > { %s416_s11 = scalar_lea.hbm %s699_s0, 768  ;;  %p417_p7 = scmp.lt.u32.totalorder %s590_s30, %s699_s0 }
  0x17   : > { %p414_p4 = pnand %p413_p3, %p412_p2  ;;  %p418_p8 = scmp.lt.u32.totalorder %s416_s11, %s411_s8 }
  0x18   : > { %p420_p9 = scmp.lt.u32.totalorder %s411_s8, %s590_s30 }
  0x19   : > { %p415_p5 = pneg %p414_p4  ;;  %p419_p10 = por %p418_p8, %p417_p7 }
  0x1b   : > { %p421_p0 = por %p420_p9, %p419_p10 }
  0x1d   : > { %p422_p1 = pnand %p421_p0, %p415_p5 }
  0x1f   : > { %425 = shalt.err (!%p422_p1)
}
  0x20   : > { %s426_s20 = scalar_lea.vmem %s597_s6, 384  ;;  %s509_s25 = smov [#allocation2]  }
  0x21   : > { %p427_p2 = scmp.ne.s32.totalorder %s597_s6, %s426_s20  ;;  %s431_s26 = sshll.u32 %s509_s25, 4  ;;  %s432_s26 = int_to_ptr.vmem [resolvable:$false] %s431_s26 }
  0x22   : > { %s433_s27 = scalar_lea.vmem %s432_s26, 768  ;;  %p434_p11 = scmp.lt.s32.totalorder %s597_s6, %s432_s26 }
  0x23   : > { %p429_p4 = pnand %p427_p2, %p413_p3  ;;  %p435_p7 = scmp.lt.s32.totalorder %s433_s27, %s426_s20 }
  0x25   : > { %p430_p12 = pneg %p429_p4  ;;  %p436_p8 = por %p435_p7, %p434_p11 }
  0x27   : > { %p437_p9 = pnand %p436_p8, %p430_p12 }
  0x29   : > { %440 = shalt.err (!%p437_p9)
}
  0x2a   : > { %368 = dma.hbm_to_vmem [thread:$0]  (!%p592_p13), %s590_s30, 384, %s597_s6, %s138_s7  }
  0x2b   : > { %p708_p0 = scmp.lt.s32.totalorder %s507_s15, 3  ;;  %p709_p1 = scmp.ge.s32.totalorder %s507_s15, 1 }
  0x2d   : > { %p155_p3 = pnand %p709_p1, %p708_p0 }
  0x2e   : > { %s630_s28 = sand.u32 (!%p155_p3), 1, %s499_s13  }
  0x2f   : > { %158 = sbr.rel (%p155_p3) target bundleno = 405 (0x195), region = 32  ;;  %s161_s5 = scalar_lea.sflag (!%p155_p3), [#allocation3], %s630_s28 }
  0x30   : > { %s359_s29 = smul.u32 (!%p155_p3), 24, %s630_s28 }
  0x32   : > { %s164_s4 = scalar_lea.vmem (!%p155_p3), [#allocation2], %s359_s29 }
  0x36   : > { %486 = dma.done.wait (%p570_p6), %s161_s5, 384  }
  0x37   : > { %488 = vsyncadd (%p570_p6), %s161_s5, 4294966912  ;;  %vm193_vm0 = vcmask 359424   ;;  %v187_v0 = vld [vmem:[%s164_s4] sm:$0xff]  ;;  %v188_v1 = vld [vmem:[%s164_s4 + $0x8] sm:$0xff]  ;;  %v224_v24 = vlaneseq  ;;  %s360_s8 = smul.u32 384, %s552_s16  ;;  %s186_s9 = scalar_lea.vmem [#allocation5], %s359_s29 }
  0x38   : > { %v189_v2 = vld [vmem:[%s164_s4 + $0x10] sm:$0xff]  ;;  %v192_v3 = vadd.f32 %v188_v1, %v187_v0  ;;  %v190_v30 = vld [vmem:[%s700_s1] sm:$0x7]  ;;  %s279_s10 = sshll.u32 %s186_s9, 4  ;;  %s265_s16 = scalar_lea.sflag [#allocation4], %s630_s28  ;;  %s656_s10 = int_to_ptr.vmem [resolvable:$true] %s279_s10 }
  0x39   : > { %v194_v4 = vsel %vm193_vm0, %v189_v2, 0.0  ;;  %v225_v26 = vshrl.u32 %v224_v24, 7  ;;  %v191_v31 = vld [vmem:[%s701_s2] sm:$0x7]  ;;  %s654_s19 = scalar_lea.hbm %s702_s3, %s360_s8  ;;  %s441_s20 = scalar_lea.vmem %s656_s10, 384 }
  0x3a   : > { %v195_v5 = vadd.f32 %v194_v4, %v192_v3  ;;  %p442_p6 = scmp.ne.s32.totalorder %s656_s10, %s441_s20  ;;  %p710_p11 = scmp.ne.s32.totalorder %s705_s23, 0 }
  0x3b   : > { %v226_v27 = vsub.s32 0, %v225_v26  ;;  %v230_v28 = vsub.s32 1, %v225_v26  ;;  %v234_v29 = vsub.s32 2, %v225_v26  ;;  %s510_s25 = smov [#allocation5]  }
  0x3c   : > { %196 = vadd.xlane.f32.xlu0 %v195_v5  ;;  %p443_p12 = pnand %p442_p6, %p710_p11  ;;  %s445_s26 = sshll.u32 %s510_s25, 4  ;;  %s446_s26 = int_to_ptr.vmem [resolvable:$false] %s445_s26 }
  0x3d   : > { %v227_v32 = vrot.slane %v190_v30, %v226_v27  ;;  %v231_v33 = vrot.slane %v190_v30, %v230_v28  ;;  %v235_v34 = vrot.slane %v190_v30, %v234_v29  ;;  %v246_v36 = vrot.slane %v191_v31, %v226_v27  ;;  %s447_s27 = scalar_lea.vmem %s446_s26, 768  ;;  %p448_p5 = scmp.lt.s32.totalorder %s656_s10, %s446_s26 }
  0x3e   : > { %v250_v37 = vrot.slane %v191_v31, %v230_v28  ;;  %v254_v41 = vrot.slane %v191_v31, %v234_v29  ;;  %p444_p13 = pneg %p443_p12  ;;  %p449_p10 = scmp.lt.s32.totalorder %s447_s27, %s441_s20 }
  0x40   : > { %p450_p2 = por %p449_p10, %p448_p5 }
  0x42   : > { %p451_p4 = pnand %p450_p2, %p444_p13 }
  0xc9   : > { %v197_v6 = vpop.xlane.xlu0 %196 }
  0xca   : > { %v198_v7 = vmul.f32 0.0033333334, %v197_v6 }
  0xcc   : > { %v199_v8 = vsub.f32 %v187_v0, %v198_v7  ;;  %v200_v9 = vsub.f32 %v188_v1, %v198_v7  ;;  %v201_v10 = vsub.f32 %v189_v2, %v198_v7 }
  0xce   : > { %v202_v11 = vmul.f32 %v199_v8, %v199_v8  ;;  %v203_v12 = vmul.f32 %v200_v9, %v200_v9  ;;  %v204_v13 = vmul.f32 %v201_v10, %v201_v10 }
  0xd0   : > { %v205_v14 = vadd.f32 %v203_v12, %v202_v11  ;;  %v206_v15 = vsel %vm193_vm0, %v204_v13, 0.0 }
  0xd2   : > { %v207_v16 = vadd.f32 %v206_v15, %v205_v14 }
  0xd4   : > { %208 = vadd.xlane.f32.xlu0 %v207_v16 }
 0x161   : > { %v209_v17 = vpop.xlane.xlu0 %208 }
 0x162   : > { %v210_v18 = vmul.f32 0.0033444816, %v209_v17 }
 0x164   : > { %407 = vrsqrt.f32 %v210_v18  ;;  %vm213_vm1 = vcmp.eq.f32.partialorder %v210_v18, inf  ;;  %v216_v21 = vand.u32 2147483648, %v210_v18  ;;  %vm215_vm2 = vcmp.eq.f32.partialorder %v210_v18, 0.0 }
 0x16e   : > { %v408_v19 = vpop.eup %407 }
 0x16f   : > { %v212_v20 = vmul.f32 %v408_v19, %v210_v18 }
 0x171   : > { %v214_v22 = vsel %vm213_vm1, %v210_v18, %v212_v20 }
 0x172   : > { %v217_v23 = vsel %vm215_vm2, %v216_v21, %v214_v22 }
 0x173   : > { %v218_v25 = vadd.f32 0.001, %v217_v23 }
 0x175   : > { %409 = vrcp.f32 %v218_v25 }
 0x17f   : > { %v410_v35 = vpop.eup %409 }
 0x180   : > { %v220_v38 = vmul.f32 %v410_v35, %v199_v8  ;;  %v221_v39 = vmul.f32 %v410_v35, %v200_v9  ;;  %v222_v40 = vmul.f32 %v410_v35, %v201_v10 }
 0x182   : > { %v239_v42 = vmul.f32 %v227_v32, %v220_v38  ;;  %v240_v43 = vmul.f32 %v231_v33, %v221_v39  ;;  %v241_v44 = vmul.f32 %v235_v34, %v222_v40 }
 0x184   : > { %v258_v45 = vadd.f32 %v246_v36, %v239_v42  ;;  %v259_v46 = vadd.f32 %v250_v37, %v240_v43  ;;  %v260_v47 = vadd.f32 %v254_v41, %v241_v44 }
 0x186   : > { %261 = vst [vmem:[%s186_s9] sm:$0xff] %v258_v45  ;;  %262 = vst [vmem:[%s186_s9 + $0x8] sm:$0xff] %v259_v46 }
 0x187   : > { %263 = vst.msk [vmem:[%s186_s9 + $0x10] sm:$0xff] %vm193_vm0, %v260_v47 }
 0x188   : > { %454 = shalt.err (!%p451_p4)
}
 0x189   : > { %s455_s28 = scalar_lea.hbm %s654_s19, 384  ;;  %s459_s4 = scalar_lea.hbm %s702_s3, 768 }
 0x18a   : > { %p456_p7 = scmp.ne.s32.totalorder %s654_s19, %s455_s28  ;;  %p460_p0 = scmp.lt.u32.totalorder %s654_s19, %s702_s3 }
 0x18b   : > { %p461_p1 = scmp.lt.u32.totalorder %s459_s4, %s455_s28  ;;  %p463_p6 = scmp.lt.u32.totalorder %s455_s28, %s654_s19 }
 0x18c   : > { %p457_p8 = pnand %p456_p7, %p710_p11 }
 0x18d   : > { %p462_p3 = por %p461_p1, %p460_p0 }
 0x18e   : > { %p458_p9 = pneg %p457_p8 }
 0x18f   : > { %p464_p12 = por %p463_p6, %p462_p3 }
 0x191   : > { %p465_p13 = pnand %p464_p12, %p458_p9 }
 0x193   : > { %468 = shalt.err (!%p465_p13)
}
 0x194   : > { %363 = dma.vmem_to_hbm [thread:$0]  (%p710_p11), %s656_s10, 384, %s654_s19, %s265_s16  }
 0x195 PF: > { %s291_s6 = sand.u32 1, %s495_s12   ;;  %p711_p5 = scmp.ne.s32.totalorder %s706_s24, 0 }
 0x196   : > { %p712_p10 = scmp.ge.s32.totalorder %s507_s15, 2  ;;  %s292_s7 = scalar_lea.sflag [#allocation4], %s291_s6 }
 0x198   : > { %p370_p2 = pnand %p712_p10, %p711_p5 }
 0x19a   : > { %490 = dma.done.wait (!%p370_p2), %s292_s7, 384  }
 0x19b   : > { %492 = vsyncadd (!%p370_p2), %s292_s7, 4294966912  ;;  %p16_p4 = scmp.ge.s32.totalorder %s556_s18, 4   ;;  %s713_s12 = smov %s499_s13 }
 0x19c   : > { %s714_s13 = smov %s503_s14  ;;  %s715_s14 = smov %s568_s21 }
 0x19d   : > { %s716_s15 = smov %s556_s18  ;;  %18 = sbr.rel (!%p16_p4) target bundleno = 5 (0x5), region = 77 }
 0x1a4   :  { %297 = vsyncpa [#allocation3], 1 }
 0x1a5   :  { %299 = vsyncpa [#allocation3 + $0x1], 1 }
 0x1a6   :  { %300 = vsyncpa [#allocation4], 1 }
 0x1a7   :  { %302 = vsyncpa [#allocation4 + $0x1], 1 }

</bundles_post_ra>
